<compile_context>
chip_gen: v7x
topology: tpu7x:2x2x1
jax: 0.10.0
libtpu: 0.0.40
codegen_flags: <defaults>
</compile_context>

<pallas_src>
import functools

import jax
import jax.numpy as jnp
from jax.experimental import pallas as pl
from jax.experimental.pallas import tpu as pltpu

LANE = 128     # vreg lane width    -> last-dim alignment for padded dims
SUBLANE = 8    # vreg sublane height -> second-to-last-dim alignment


def _round_up(x, m):
    return ((x + m - 1) // m) * m


def _pad2d(a, rows, cols):
    return jnp.pad(a, ((0, rows - a.shape[0]), (0, cols - a.shape[1])))


def _resident_spec(block_shape):
    """BlockSpec for a whole-array operand with a constant index_map.

    Single-buffered: the block is identical for every grid step, so the default
    double buffer would be dead VMEM (the block is never re-fetched anyway)."""
    idx = lambda i: (0, 0)
    try:
        return pl.BlockSpec(block_shape, idx, pipeline_mode=pl.Buffered(1))
    except (TypeError, AttributeError):   # older jax without pipeline_mode
        return pl.BlockSpec(block_shape, idx)


@functools.lru_cache(maxsize=None)
def _num_tensorcores():
    """v7x packs 2 TensorCores per chip -> need >=2 'parallel' grid steps to use
    both.  v5e/v6e are single-TC, where extra grid steps are pure overhead."""
    try:
        kind = jax.devices()[0].device_kind.lower()
    except Exception:
        return 1
    return 2 if "v7" in kind else 1


def _batch_tiling(n, block_b, min_steps=1):
    """Pick an 8-aligned batch tile.  Clamp to the batch for small n (single
    grid step on single-TC chips); cap it so there are >= min_steps steps on
    multi-TC chips.  No padding of n: the ragged last block is masked."""
    if min_steps > 1:
        block_b = min(block_b, pl.cdiv(n, min_steps))
    block_b = _round_up(max(1, min(block_b, n)), SUBLANE)
    steps = pl.cdiv(n, block_b)
    return block_b, steps


# ---------------------------------------------------------------------------
# Kernels
# ---------------------------------------------------------------------------
def affine_kernel(x_ref, w_ref, b_ref, o_ref):
    """Primary kernel: o = x @ W + b (the 4 Linear layers algebraically folded)."""
    w = w_ref[...]
    x = x_ref[...].astype(w.dtype)                        # dot operands in W's dtype
    y = jnp.dot(x, w, preferred_element_type=jnp.float32) + b_ref[...]  # f32 acc+bias
    o_ref[...] = y.astype(o_ref.dtype)


def mlp4_kernel(x_ref, w1_ref, b1_ref, w2_ref, b2_ref, w3_ref, b3_ref,
                w4_ref, b4_ref, o_ref):
    """Un-folded variant: all four Linear layers fused in one kernel (use this
    one when activations are inserted between the layers)."""
    dt = w1_ref.dtype
    h = jnp.dot(x_ref[...].astype(dt), w1_ref[...],
                preferred_element_type=jnp.float32) + b1_ref[...]
    h = jnp.dot(h.astype(dt), w2_ref[...],
                preferred_element_type=jnp.float32) + b2_ref[...]
    h = jnp.dot(h.astype(dt), w3_ref[...],
                preferred_element_type=jnp.float32) + b3_ref[...]
    y = jnp.dot(h.astype(dt), w4_ref[...],
                preferred_element_type=jnp.float32) + b4_ref[...]
    o_ref[...] = y.astype(o_ref.dtype)


# ---------------------------------------------------------------------------
# Parameter preparation (done once, outside the per-step jit)
# ---------------------------------------------------------------------------
def fold_params(params, dot_dtype=jnp.bfloat16):
    """Collapse mlp1..mlp4 into a single (d_in, out_p) weight and (1, out_p)
    bias (exact: no activations between the layers).  Only the output dim is
    padded (lane-dense 128); d_in keeps its natural size (just 8-aligned)."""
    hp = jax.lax.Precision.HIGHEST

    def dot(a, b):
        return jnp.dot(a, b, precision=hp)

    w = dot(dot(dot(params["w1t"], params["w2t"]), params["w3t"]), params["w4t"])
    b = dot(dot(dot(params["b1"], params["w2t"]) + params["b2"],
                params["w3t"]) + params["b3"], params["w4t"]) + params["b4"]
    d_in, num_classes = w.shape
    d_in_p = _round_up(d_in, SUBLANE)        # 784 -> 784 (no pad needed)
    out_p = _round_up(num_classes, LANE)     # 10  -> 128 (lane-dense stores)
    w = _pad2d(w, d_in_p, out_p).astype(dot_dtype)
    b = _pad2d(b, 1, out_p).astype(jnp.float32)   # bias add stays f32 (VPU)
    return w, b


def pad_params(params, dot_dtype=jnp.bfloat16):
    """Zero-pad hidden/output dims to lane-dense shapes (exact) and cast dot
    operands to dot_dtype.  d_in is only sublane(8)-aligned.  For the un-folded
    4-matmul kernel."""
    d_in, hidden = params["w1t"].shape
    num_classes = params["w4t"].shape[1]
    d_in_p = _round_up(d_in, SUBLANE)        # 784 -> 784
    hid_p = _round_up(hidden, LANE)          # 500 -> 512 (lane dim of h1..h3)
    out_p = _round_up(num_classes, LANE)     # 10  -> 128
    return dict(
        w1t=_pad2d(params["w1t"], d_in_p, hid_p).astype(dot_dtype),
        b1=_pad2d(params["b1"], 1, hid_p),
        w2t=_pad2d(params["w2t"], hid_p, hid_p).astype(dot_dtype),
        b2=_pad2d(params["b2"], 1, hid_p),
        w3t=_pad2d(params["w3t"], hid_p, hid_p).astype(dot_dtype),
        b3=_pad2d(params["b3"], 1, hid_p),
        w4t=_pad2d(params["w4t"], hid_p, out_p).astype(dot_dtype),
        b4=_pad2d(params["b4"], 1, out_p),
    )


# ---------------------------------------------------------------------------
# Forward wrappers
# ---------------------------------------------------------------------------
@functools.partial(jax.jit, static_argnames=("num_classes", "block_b"))
def mlp_forward_folded(x_nchw, w_fold, b_fold, *, num_classes, block_b=256):
    n = x_nchw.shape[0]
    x = x_nchw.reshape(n, -1)                             # torch.reshape equivalent
    d_in = x.shape[1]
    d_in_p, out_p = w_fold.shape
    if d_in_p != d_in:                                    # never taken for 784
        x = jnp.pad(x, ((0, 0), (0, d_in_p - d_in)))

    block_b, steps = _batch_tiling(n, block_b, _num_tensorcores())

    cost = pl.CostEstimate(
        flops=2 * n * d_in_p * out_p,
        transcendentals=0,
        bytes_accessed=(x.size * x.dtype.itemsize
                        + w_fold.size * w_fold.dtype.itemsize
                        + b_fold.size * b_fold.dtype.itemsize
                        + n * out_p * 4))

    out = pl.pallas_call(
        affine_kernel,
        out_shape=jax.ShapeDtypeStruct((n, out_p), jnp.float32),
        grid=(steps,),
        in_specs=[
            pl.BlockSpec((block_b, d_in_p), lambda i: (i, 0)),   # batch tile
            _resident_spec((d_in_p, out_p)),                     # folded W (resident)
            _resident_spec((1, out_p)),                          # folded b (resident)
        ],
        out_specs=pl.BlockSpec((block_b, out_p), lambda i: (i, 0)),  # lane-dense
        compiler_params=pltpu.CompilerParams(
            dimension_semantics=("parallel",)),                  # megacore / v7x 2-TC
        cost_estimate=cost,
    )(x, w_fold, b_fold)
    # out_p stays at 128: padding logits to 256 would only double write bytes
    # for zero logical benefit (num_classes=10 is shape-inherent).
    return out[:, :num_classes]


@functools.partial(jax.jit, static_argnames=("num_classes", "block_b"))
def mlp_forward_fused(x_nchw, padded_params, *, num_classes, block_b=256):
    n = x_nchw.shape[0]
    x = x_nchw.reshape(n, -1)
    d_in = x.shape[1]
    p = padded_params
    d_in_p, hid_p = p["w1t"].shape
    out_p = p["w4t"].shape[1]
    if d_in_p != d_in:
        x = jnp.pad(x, ((0, 0), (0, d_in_p - d_in)))

    block_b, steps = _batch_tiling(n, block_b, _num_tensorcores())

    cost = pl.CostEstimate(
        flops=2 * n * (d_in_p * hid_p + 2 * hid_p * hid_p + hid_p * out_p),
        transcendentals=0,
        bytes_accessed=(x.size * x.dtype.itemsize
                        + sum(v.size * v.dtype.itemsize for v in p.values())
                        + n * out_p * 4))

    # Scaling guard (v7x, 64 MiB VMEM): whole-weight residency of W2/W3 breaks
    # past hidden_size ~2k; at that point add a K-tiled ("arbitrary") grid axis
    # over the hidden dim with an f32 VMEM accumulator instead of raising
    # vmem_limit_bytes.  Not needed at hidden_size=500.
    out = pl.pallas_call(
        mlp4_kernel,
        out_shape=jax.ShapeDtypeStruct((n, out_p), jnp.float32),
        grid=(steps,),
        in_specs=[
            pl.BlockSpec((block_b, d_in_p), lambda i: (i, 0)),   # batch tile
            _resident_spec((d_in_p, hid_p)),                     # W1^T
            _resident_spec((1, hid_p)),                          # b1
            _resident_spec((hid_p, hid_p)),                      # W2^T
            _resident_spec((1, hid_p)),                          # b2
            _resident_spec((hid_p, hid_p)),                      # W3^T
            _resident_spec((1, hid_p)),                          # b3
            _resident_spec((hid_p, out_p)),                      # W4^T (padded to 128)
            _resident_spec((1, out_p)),                          # b4
        ],
        out_specs=pl.BlockSpec((block_b, out_p), lambda i: (i, 0)),
        compiler_params=pltpu.CompilerParams(
            dimension_semantics=("parallel",)),
        cost_estimate=cost,
    )(x, p["w1t"], p["b1"], p["w2t"], p["b2"],
      p["w3t"], p["b3"], p["w4t"], p["b4"])
    return out[:, :num_classes]


# ---------------------------------------------------------------------------
# Init + reference
# ---------------------------------------------------------------------------
def init_linear(key, fan_in, fan_out):
    """nn.Linear-style uniform(+-1/sqrt(fan_in)); weight stored transposed (in, out)."""
    kw, kb = jax.random.split(key)
    bound = 1.0 / jnp.sqrt(float(fan_in))
    w_t = jax.random.uniform(kw, (fan_in, fan_out), jnp.float32, -bound, bound)
    b = jax.random.uniform(kb, (1, fan_out), jnp.float32, -bound, bound)
    return w_t, b


def mlp_reference(x_nchw, params):
    hp = jax.lax.Precision.HIGHEST
    x = x_nchw.reshape(x_nchw.shape[0], -1)
    h = jnp.dot(x, params["w1t"], precision=hp) + params["b1"]
    h = jnp.dot(h, params["w2t"], precision=hp) + params["b2"]
    h = jnp.dot(h, params["w3t"], precision=hp) + params["b3"]
    return jnp.dot(h, params["w4t"], precision=hp) + params["b4"]


if __name__ == "__main__":
    # Shapes from the original script: image_size=28, hidden_size=500,
    # num_classes=10, batch_size=100; input is NCHW with 1 channel.
    batch_size, image_size, hidden_size, num_classes = 100, 28, 500, 10

    key = jax.random.PRNGKey(0)
    kx, k1, k2, k3, k4 = jax.random.split(key, 5)
    x = jax.random.normal(kx, (batch_size, 1, image_size, image_size), jnp.float32)

    d_in = image_size * image_size
    w1t, b1 = init_linear(k1, d_in, hidden_size)
    w2t, b2 = init_linear(k2, hidden_size, hidden_size)
    w3t, b3 = init_linear(k3, hidden_size, hidden_size)
    w4t, b4 = init_linear(k4, hidden_size, num_classes)
    params = dict(w1t=w1t, b1=b1, w2t=w2t, b2=b2,
                  w3t=w3t, b3=b3, w4t=w4t, b4=b4)

    # NOTE: self.test (Conv2d stack), self.fc_s1 and self.fc_s2 are defined in
    # __init__ but never used in forward(), so they are intentionally omitted.

    ref = mlp_reference(x, params)

    # 1) Primary path: folded single-matmul kernel, bf16 dot operands (default),
    #    f32 accumulation + f32 bias.
    w_fold, b_fold = fold_params(params)                  # fold once, outside jit
    out = mlp_forward_folded(x, w_fold, b_fold, num_classes=num_classes)
    jax.block_until_ready(out)
    assert out.shape == (batch_size, num_classes)
    assert jnp.allclose(out, ref, atol=5e-2, rtol=5e-2)

    # 2) Folded kernel with f32 dot operands (tight tolerance).
    w_f32, b_f32 = fold_params(params, dot_dtype=jnp.float32)
    out_f32 = mlp_forward_folded(x, w_f32, b_f32, num_classes=num_classes)
    jax.block_until_ready(out_f32)
    assert jnp.allclose(out_f32, ref, atol=5e-3, rtol=5e-3)

    # 3) Ragged batch + multi-step grid (exercises masked partial blocks and
    #    the no-pad batch path).
    n_odd = 37
    out_odd = mlp_forward_folded(x[:n_odd], w_f32, b_f32,
                                 num_classes=num_classes, block_b=24)
    jax.block_until_ready(out_odd)
    assert out_odd.shape == (n_odd, num_classes)
    assert jnp.allclose(out_odd, ref[:n_odd], atol=5e-3, rtol=5e-3)

    # 4) Un-folded fully-fused 4-matmul kernel (for when activations are added),
    #    bf16 dot operands (default), f32 accumulation.
    out4 = mlp_forward_fused(x, pad_params(params), num_classes=num_classes)
    jax.block_until_ready(out4)
    assert jnp.allclose(out4, ref, atol=5e-2, rtol=5e-2)

    print("KERNEL_OK")
</pallas_src>

<mosaic_0001>
module attributes {stable_mosaic.version = 11 : i64} {
  func.func @affine_kernel(%arg0: i32, %arg1: memref<104x784xf32, #tpu.memory_space<vmem>>, %arg2: memref<784x128xbf16, #tpu.memory_space<vmem>>, %arg3: memref<1x128xf32, #tpu.memory_space<vmem>>, %arg4: memref<104x128xf32, #tpu.memory_space<vmem>>) attributes {dimension_semantics = [#tpu.dimension_semantics<parallel>], iteration_bounds = array<i64: 1>, scalar_prefetch = 0 : i64, scratch_operands = 0 : i64, tpu.core_type = #tpu.core_type<tc>, window_params = [{transform_indices = @transform_0, window_bounds = array<i64: 104, 784>}, {pipeline_mode = #tpu.pipeline_mode<synchronous>, transform_indices = @transform_1, window_bounds = array<i64: 784, 128>}, {pipeline_mode = #tpu.pipeline_mode<synchronous>, transform_indices = @transform_2, window_bounds = array<i64: 1, 128>}, {transform_indices = @transform_3, window_bounds = array<i64: 104, 128>}]} {
    %c0 = arith.constant 0 : index
    %c0_0 = arith.constant 0 : index
    %0 = vector.load %arg2[%c0, %c0_0] : memref<784x128xbf16, #tpu.memory_space<vmem>>, vector<784x128xbf16>
    %c0_1 = arith.constant 0 : index
    %c0_2 = arith.constant 0 : index
    %1 = vector.load %arg1[%c0_1, %c0_2] : memref<104x784xf32, #tpu.memory_space<vmem>>, vector<104x784xf32>
    %2 = arith.truncf %1 : vector<104x784xf32> to vector<104x784xbf16>
    %cst = arith.constant dense<0.000000e+00> : vector<104x128xf32>
    %3 = tpu.matmul %2, %0, %cst {dimension_numbers = #tpu.dot_dimension_numbers<[1], [0], [0], [1], [0, 0, 1, 1], [], []>} : vector<104x784xbf16>, vector<784x128xbf16>, vector<104x128xf32> -> vector<104x128xf32>
    %c0_3 = arith.constant 0 : index
    %c0_4 = arith.constant 0 : index
    %4 = vector.load %arg3[%c0_3, %c0_4] : memref<1x128xf32, #tpu.memory_space<vmem>>, vector<1x128xf32>
    %5 = vector.broadcast %4 : vector<1x128xf32> to vector<104x128xf32>
    %6 = arith.addf %3, %5 : vector<104x128xf32>
    %c0_5 = arith.constant 0 : index
    %c0_6 = arith.constant 0 : index
    %7 = vector.load %arg4[%c0_5, %c0_6] : memref<104x128xf32, #tpu.memory_space<vmem>>, vector<104x128xf32>
    tpu.vector_store %arg4[%c0_5, %c0_6], %6 {strides = array<i32>} : memref<104x128xf32, #tpu.memory_space<vmem>>, vector<104x128xf32>,
    return
  }
  func.func @transform_0(%arg0: i32) -> (i32, i32) {
    %c0_i32 = arith.constant 0 : i32
    %c0_i32_0 = arith.constant 0 : i32
    return %arg0, %c0_i32 : i32, i32
  }
  func.func @transform_1(%arg0: i32) -> (i32, i32) {
    %c0_i32 = arith.constant 0 : i32
    %c0_i32_0 = arith.constant 0 : i32
    %c0_i32_1 = arith.constant 0 : i32
    return %c0_i32, %c0_i32_0 : i32, i32
  }
  func.func @transform_2(%arg0: i32) -> (i32, i32) {
    %c0_i32 = arith.constant 0 : i32
    %c0_i32_0 = arith.constant 0 : i32
    %c0_i32_1 = arith.constant 0 : i32
    return %c0_i32, %c0_i32_0 : i32, i32
  }
  func.func @transform_3(%arg0: i32) -> (i32, i32) {
    %c0_i32 = arith.constant 0 : i32
    %c0_i32_0 = arith.constant 0 : i32
    return %arg0, %c0_i32 : i32, i32
  }
}

</mosaic_0001>

<bundles_post_ra>
// kernel: mlp_forward_folded.1
= control target key start
LH: loop header
LB: loop body
LE: loop exit
PB: predicated region body
PF: predicated region fallthrough
CT: control target
= control target key end

     0   :  { %v1265_v43 = vmov 0.0   ;;  %vm1266_vm0 = vmmov 0   ;;  %vm554_vm1 = vcmask 130048   ;;  %s1825_s1 = inlined_call_operand.vmem [shape: bf16[784,128], index: 1, kind: input, shape index: {}]   ;;  %s1826_s0 = inlined_call_operand.vmem [shape: f32[100,784], index: 0, kind: input, shape index: {}]   ;;  %s1827_s2 = inlined_call_operand.vmem [shape: f32[1,128], index: 2, kind: input, shape index: {}]   ;;  %s1828_s3 = inlined_call_operand.vmem [shape: f32[100,128], index: 3, kind: output, shape index: {}]  }
   0x1   :  { %v1216_v0 = vld [vmem:[%s1825_s1 + $0x40] sm:$0xff]   ;;  %v1220_v4 = vld [vmem:[%s1825_s1 + $0x48] sm:$0xff]   ;;  %v1224_v8 = vld [vmem:[%s1825_s1 + $0x50] sm:$0xff]  }
   0x2   :  { %v1217_v1 = vld [vmem:[%s1825_s1] sm:$0xff]   ;;  %1002 = vmatprep.subr.bf16.mxu0 %v1216_v0  ;;  %v1221_v5 = vld [vmem:[%s1825_s1 + $0x8] sm:$0xff]   ;;  %v1225_v9 = vld [vmem:[%s1825_s1 + $0x10] sm:$0xff]  }
   0x3   :  { %v1218_v2 = vld [vmem:[%s1825_s1 + $0xc0] sm:$0xff]   ;;  %1003 = vmatpush3.bf16.msra.mxu0 %v1217_v1  ;;  %v1222_v6 = vld [vmem:[%s1825_s1 + $0xc8] sm:$0xff]   ;;  %v1226_v10 = vld [vmem:[%s1825_s1 + $0xd0] sm:$0xff]  }
   0x4   :  { %v1219_v3 = vld [vmem:[%s1825_s1 + $0x80] sm:$0xff]   ;;  %1060 = vmatprep.subr.bf16.mxu1 %v1218_v2  ;;  %1004 = vmatprep.subr.bf16.mxu0 %v1220_v4  ;;  %v1223_v7 = vld [vmem:[%s1825_s1 + $0x88] sm:$0xff]   ;;  %v1227_v11 = vld [vmem:[%s1825_s1 + $0x90] sm:$0xff]  }
   0x5   :  { %1061 = vmatpush3.bf16.msra.mxu1 %v1219_v3  ;;  %v1228_v12 = vld [vmem:[%s1825_s1 + $0x58] sm:$0xff]   ;;  %v1232_v16 = vld [vmem:[%s1825_s1 + $0x60] sm:$0xff]   ;;  %v1236_v20 = vld [vmem:[%s1825_s1 + $0x68] sm:$0xff]  }
   0x6   :  { %1062 = vmatprep.subr.bf16.mxu1 %v1222_v6  ;;  %v1229_v13 = vld [vmem:[%s1825_s1 + $0x18] sm:$0xff]   ;;  %v1233_v17 = vld [vmem:[%s1825_s1 + $0x20] sm:$0xff]   ;;  %v1237_v21 = vld [vmem:[%s1825_s1 + $0x28] sm:$0xff]  }
   0x7   :  { %1005 = vmatpush3.bf16.msra.mxu0 %v1221_v5  ;;  %v1230_v14 = vld [vmem:[%s1825_s1 + $0xd8] sm:$0xff]   ;;  %v1234_v18 = vld [vmem:[%s1825_s1 + $0xe0] sm:$0xff]   ;;  %v1238_v22 = vld [vmem:[%s1825_s1 + $0xe8] sm:$0xff]  }
   0x8   :  { %1006 = vmatprep.subr.bf16.mxu0 %v1224_v8  ;;  %v1231_v15 = vld [vmem:[%s1825_s1 + $0x98] sm:$0xff]   ;;  %v1235_v19 = vld [vmem:[%s1825_s1 + $0xa0] sm:$0xff]   ;;  %v1239_v23 = vld [vmem:[%s1825_s1 + $0xa8] sm:$0xff]  }
   0x9   :  { %1063 = vmatpush3.bf16.msra.mxu1 %v1223_v7  ;;  %v1240_v24 = vld [vmem:[%s1825_s1 + $0x70] sm:$0xff]   ;;  %v1244_v28 = vld [vmem:[%s1825_s1 + $0x78] sm:$0xff]   ;;  %v114_v31 = vld [vmem:[%s1826_s0 + $0x8] sm:$0xff] }
   0xa   :  { %1064 = vmatprep.subr.bf16.mxu1 %v1226_v10  ;;  %v1241_v25 = vld [vmem:[%s1825_s1 + $0x30] sm:$0xff]   ;;  %v1245_v29 = vld [vmem:[%s1825_s1 + $0x38] sm:$0xff]   ;;  %v121_v32 = vld [vmem:[%s1826_s0 + $0x40] sm:$0xff] }
   0xb   :  { %1007 = vmatpush3.bf16.msra.mxu0 %v1225_v9  ;;  %v1242_v26 = vld [vmem:[%s1825_s1 + $0xf0] sm:$0xff]   ;;  %v1246_v30 = vld [vmem:[%s1825_s1 + $0xf8] sm:$0xff]   ;;  %v205_v33 = vpack.c.bf16 %v121_v32, %v114_v31  ;;  %v113_v35 = vld [vmem:[%s1826_s0] sm:$0xff] }
   0xc   :  { %1008 = vmatprep.subr.bf16.mxu0 %v1228_v12  ;;  %v1243_v27 = vld [vmem:[%s1825_s1 + $0xb0] sm:$0xff]   ;;  %v1247_v34 = vld [vmem:[%s1825_s1 + $0xb8] sm:$0xff]   ;;  %v1248_v38 = vld [vmem:[%s1825_s1 + $0x140] sm:$0xff]  }
   0xd   :  { %1065 = vmatpush3.bf16.msra.mxu1 %v1227_v11  ;;  %v120_v36 = vld [vmem:[%s1826_s0 + $0x38] sm:$0xff]  ;;  %608 = vmatprep.mubr.bf16.mxu0 %v205_v33  ;;  %v123_v40 = vld [vmem:[%s1826_s0 + $0x50] sm:$0xff]  ;;  %v1249_v42 = vld [vmem:[%s1825_s1 + $0x100] sm:$0xff]  }
   0xe   :  { %1066 = vmatprep.subr.bf16.mxu1 %v1230_v14  ;;  %v204_v37 = vpack.c.bf16 %v120_v36, %v113_v35  ;;  %v116_v39 = vld [vmem:[%s1826_s0 + $0x18] sm:$0xff]  ;;  %v115_v44 = vld [vmem:[%s1826_s0 + $0x10] sm:$0xff]  ;;  %v122_v45 = vld [vmem:[%s1826_s0 + $0x48] sm:$0xff] }
   0xf   :  { %1009 = vmatpush3.bf16.msra.mxu0 %v1229_v13  ;;  %v207_v41 = vpack.c.bf16 %v123_v40, %v116_v39  ;;  %v206_v46 = vpack.c.bf16 %v122_v45, %v115_v44  ;;  %v1250_v47 = vld [vmem:[%s1825_s1 + $0x180] sm:$0xff]   ;;  %v128_v48 = vld [vmem:[%s1826_s0 + $0x78] sm:$0xff]  ;;  %v135_v49 = vld [vmem:[%s1826_s0 + $0xb0] sm:$0xff] }
  0x10   :  { %1010 = vmatprep.subr.bf16.mxu0 %v1232_v16  ;;  %v212_v50 = vpack.c.bf16 %v135_v49, %v128_v48  ;;  %v1251_v51 = vld [vmem:[%s1825_s1 + $0x148] sm:$0xff]   ;;  %v127_v52 = vld [vmem:[%s1826_s0 + $0x70] sm:$0xff]  ;;  %v137_v57 = vld [vmem:[%s1826_s0 + $0xc0] sm:$0xff] }
  0x11   :  { %1067 = vmatpush3.bf16.msra.mxu1 %v1231_v15  ;;  %696 = vmatprep.mubr.bf16.mxu1 %v207_v41  ;;  %v134_v53 = vld [vmem:[%s1826_s0 + $0xa8] sm:$0xff]  ;;  %v129_v58 = vld [vmem:[%s1826_s0 + $0x80] sm:$0xff]  ;;  %v136_v60 = vld [vmem:[%s1826_s0 + $0xb8] sm:$0xff] }
  0x12   :  { %1068 = vmatprep.subr.bf16.mxu1 %v1234_v18  ;;  %v211_v54 = vpack.c.bf16 %v134_v53, %v127_v52  ;;  %v1252_v55 = vld [vmem:[%s1825_s1 + $0x108] sm:$0xff]   ;;  %v213_v61 = vpack.c.bf16 %v136_v60, %v129_v58  ;;  %v1253_v62 = vld [vmem:[%s1825_s1 + $0x150] sm:$0xff]   ;;  %v149_v0 = vld [vmem:[%s1826_s0 + $0x120] sm:$0xff] }
  0x13   :  { %1011 = vmatpush3.bf16.msra.mxu0 %v1233_v17  ;;  %v130_v56 = vld [vmem:[%s1826_s0 + $0x88] sm:$0xff]  ;;  %v1254_v2 = vld [vmem:[%s1825_s1 + $0x110] sm:$0xff]   ;;  %v141_v3 = vld [vmem:[%s1826_s0 + $0xe0] sm:$0xff] }
  0x14   :  { %1012 = vmatprep.subr.bf16.mxu0 %v1236_v20  ;;  %v214_v59 = vpack.c.bf16 %v137_v57, %v130_v56  ;;  %v142_v63 = vld [vmem:[%s1826_s0 + $0xe8] sm:$0xff]  ;;  %v148_v4 = vld [vmem:[%s1826_s0 + $0x118] sm:$0xff]  ;;  %v151_v6 = vld [vmem:[%s1826_s0 + $0x130] sm:$0xff] }
  0x15   :  { %1069 = vmatpush3.bf16.msra.mxu1 %v1235_v19  ;;  %v219_v1 = vpack.c.bf16 %v149_v0, %v142_v63  ;;  %v144_v5 = vld [vmem:[%s1826_s0 + $0xf8] sm:$0xff]  ;;  %v143_v7 = vld [vmem:[%s1826_s0 + $0xf0] sm:$0xff]  ;;  %v150_v8 = vld [vmem:[%s1826_s0 + $0x128] sm:$0xff]  ;;  %v218_v11 = vpack.c.bf16 %v148_v4, %v141_v3 }
  0x16   :  { %1070 = vmatprep.subr.bf16.mxu1 %v1238_v22  ;;  %v221_v9 = vpack.c.bf16 %v151_v6, %v144_v5  ;;  %v1255_v10 = vld [vmem:[%s1825_s1 + $0x158] sm:$0xff]   ;;  %v163_v14 = vld [vmem:[%s1826_s0 + $0x190] sm:$0xff]  ;;  %v158_v16 = vld [vmem:[%s1826_s0 + $0x168] sm:$0xff]  ;;  %v220_v18 = vpack.c.bf16 %v150_v8, %v143_v7 }
  0x17   :  { %1013 = vmatpush3.bf16.msra.mxu0 %v1237_v21  ;;  %v1256_v12 = vld [vmem:[%s1825_s1 + $0x118] sm:$0xff]   ;;  %v165_v17 = vld [vmem:[%s1826_s0 + $0x1a0] sm:$0xff]  ;;  %v155_v19 = vld [vmem:[%s1826_s0 + $0x150] sm:$0xff] }
  0x18   :  { %1014 = vmatprep.subr.bf16.mxu0 %v1240_v24  ;;  %v156_v13 = vld [vmem:[%s1826_s0 + $0x158] sm:$0xff]  ;;  %v228_v20 = vpack.c.bf16 %v165_v17, %v158_v16  ;;  %v1257_v21 = vld [vmem:[%s1825_s1 + $0x160] sm:$0xff]   ;;  %v162_v22 = vld [vmem:[%s1826_s0 + $0x188] sm:$0xff] }
  0x19   :  { %1071 = vmatpush3.bf16.msra.mxu1 %v1239_v23  ;;  %v226_v15 = vpack.c.bf16 %v163_v14, %v156_v13  ;;  %v1258_v23 = vld [vmem:[%s1825_s1 + $0x120] sm:$0xff]   ;;  %v170_v24 = vld [vmem:[%s1826_s0 + $0x1c8] sm:$0xff]  ;;  %v176_v36 = vld [vmem:[%s1826_s0 + $0x1f8] sm:$0xff] }
  0x1a   :  { %1072 = vmatprep.subr.bf16.mxu1 %v1242_v26  ;;  %v157_v26 = vld [vmem:[%s1826_s0 + $0x160] sm:$0xff]  ;;  %v1259_v32 = vld [vmem:[%s1825_s1 + $0x168] sm:$0xff]   ;;  %v191_v39 = vld [vmem:[%s1826_s0 + $0x270] sm:$0xff] }
  0x1b   :  { %1015 = vmatpush3.bf16.msra.mxu0 %v1241_v25  ;;  %v177_v25 = vld [vmem:[%s1826_s0 + $0x200] sm:$0xff]  ;;  %v1260_v33 = vld [vmem:[%s1825_s1 + $0x128] sm:$0xff]   ;;  %v1261_v40 = vld [vmem:[%s1825_s1 + $0x170] sm:$0xff]  }
  0x1c   :  { %1016 = vmatprep.subr.bf16.mxu0 %v1244_v28  ;;  %v172_v28 = vld [vmem:[%s1826_s0 + $0x1d8] sm:$0xff]  ;;  %v233_v31 = vpack.c.bf16 %v177_v25, %v170_v24  ;;  %v169_v35 = vld [vmem:[%s1826_s0 + $0x1c0] sm:$0xff]  ;;  %v1262_v41 = vld [vmem:[%s1825_s1 + $0x130] sm:$0xff]  }
  0x1d   :  { %1073 = vmatpush3.bf16.msra.mxu1 %v1243_v27  ;;  %v164_v27 = vld [vmem:[%s1826_s0 + $0x198] sm:$0xff]  ;;  %v178_v44 = vld [vmem:[%s1826_s0 + $0x208] sm:$0xff]  ;;  %v193_v49 = vld [vmem:[%s1826_s0 + $0x280] sm:$0xff] }
  0x1e   :  { %1074 = vmatprep.subr.bf16.mxu1 %v1246_v30  ;;  %v179_v30 = vld [vmem:[%s1826_s0 + $0x210] sm:$0xff]  ;;  %v186_v45 = vld [vmem:[%s1826_s0 + $0x248] sm:$0xff]  ;;  %v185_v57 = vld [vmem:[%s1826_s0 + $0x240] sm:$0xff] }
  0x1f   :  { %1017 = vmatpush3.bf16.msra.mxu0 %v1245_v29  ;;  %v225_v29 = vpack.c.bf16 %v162_v22, %v155_v19  ;;  %v242_v52 = vpack.c.bf16 %v193_v49, %v186_v45  ;;  %v183_v53 = vld [vmem:[%s1826_s0 + $0x230] sm:$0xff]  ;;  %v192_v58 = vld [vmem:[%s1826_s0 + $0x278] sm:$0xff]  ;;  %v197_v63 = vld [vmem:[%s1826_s0 + $0x2a0] sm:$0xff] }
  0x20   :  { %1118 = vmatprep.subr.bf16.mxu0 %v1248_v38  ;;  %v184_v38 = vld [vmem:[%s1826_s0 + $0x238] sm:$0xff]  ;;  %v118_v0 = vld [vmem:[%s1826_s0 + $0x28] sm:$0xff]  ;;  %v199_v3 = vld [vmem:[%s1826_s0 + $0x2b0] sm:$0xff] }
  0x21   :  { %1075 = vmatpush3.bf16.msra.mxu1 %v1247_v34  ;;  %v227_v34 = vpack.c.bf16 %v164_v27, %v157_v26  ;;  %v240_v48 = vpack.c.bf16 %v191_v39, %v184_v38  ;;  %v200_v60 = vld [vmem:[%s1826_s0 + $0x2b8] sm:$0xff]  ;;  %v248_v5 = vpack.c.bf16 %v199_v3, %v199_v3  ;;  %v117_v6 = vld [vmem:[%s1826_s0 + $0x20] sm:$0xff]  ;;  %v138_v16 = vld [vmem:[%s1826_s0 + $0xc8] sm:$0xff] }
  0x22   :  { %1184 = vmatprep.subr.bf16.mxu1 %v1265_v43  ;;  %609 = vmatmul.mubr.bf16.vlgmr.msra.gmra.mrb[0].mxu0 %v204_v37  ;;  %v235_v37 = vpack.c.bf16 %v179_v30, %v172_v28  ;;  %v124_v7 = vld [vmem:[%s1826_s0 + $0x58] sm:$0xff]  ;;  %v146_v17 = vld [vmem:[%s1826_s0 + $0x108] sm:$0xff]  ;;  %v145_v24 = vld [vmem:[%s1826_s0 + $0x100] sm:$0xff] }
  0x23   :  { %1119 = vmatpush3.bf16.msra.mxu0 %v1249_v42  ;;  %616 = vmatprep.mubr.bf16.mxu0 %v212_v50  ;;  %v171_v42 = vld [vmem:[%s1826_s0 + $0x1d0] sm:$0xff]  ;;  %v1264_v50 = vld [vmem:[%s1825_s1 + $0x138] sm:$0xff]   ;;  %v154_v30 = vld [vmem:[%s1826_s0 + $0x148] sm:$0xff] }
  0x24   :  { %697 = vmatmul.mubr.bf16.vlgmr.msra.gmra.mrb[0].mxu1 %v206_v46  ;;  %1120 = vmatprep.subr.bf16.mxu0 %v1251_v51  ;;  %v232_v46 = vpack.c.bf16 %v176_v36, %v169_v35  ;;  %v234_v51 = vpack.c.bf16 %v178_v44, %v171_v42  ;;  %v132_v8 = vld [vmem:[%s1826_s0 + $0x98] sm:$0xff]  ;;  %v167_v27 = vld [vmem:[%s1826_s0 + $0x1b0] sm:$0xff]  ;;  %v174_v35 = vld [vmem:[%s1826_s0 + $0x1e8] sm:$0xff] }
  0x25   :  { %1185 = vmatpush3.bf16.msra.mxu1 %v1250_v47  ;;  %704 = vmatprep.mubr.bf16.mxu1 %v214_v59  ;;  %v1263_v47 = vld [vmem:[%s1825_s1 + $0x178] sm:$0xff]   ;;  %v181_v36 = vld [vmem:[%s1826_s0 + $0x220] sm:$0xff]  ;;  %v182_v49 = vld [vmem:[%s1826_s0 + $0x228] sm:$0xff] }
  0x26   :  { %v152_v25 = vld [vmem:[%s1826_s0 + $0x138] sm:$0xff]  ;;  %v161_v38 = vld [vmem:[%s1826_s0 + $0x180] sm:$0xff] }
  0x27   :  { %1121 = vmatpush3.bf16.msra.mxu0 %v1252_v55  ;;  %v198_v55 = vld [vmem:[%s1826_s0 + $0x2a8] sm:$0xff]  ;;  %v160_v26 = vld [vmem:[%s1826_s0 + $0x178] sm:$0xff]  ;;  %v222_v28 = vpack.c.bf16 %v152_v25, %v145_v24  ;;  %v173_v42 = vld [vmem:[%s1826_s0 + $0x1e0] sm:$0xff] }
  0x28   :  { %1122 = vmatprep.subr.bf16.mxu0 %v1253_v62  ;;  %v247_v59 = vpack.c.bf16 %v198_v55, %v198_v55  ;;  %v249_v62 = vpack.c.bf16 %v200_v60, %v200_v60  ;;  %v168_v39 = vld [vmem:[%s1826_s0 + $0x1b8] sm:$0xff]  ;;  %v201_v60 = vld [vmem:[%s1826_s0 + $0x2c0] sm:$0xff] }
  0x29   :  { %v180_v44 = vld [vmem:[%s1826_s0 + $0x218] sm:$0xff] }
  0x2a   :  { %617 = vmatmul.mubr.bf16.gmra.mrb[4].mxu0 %v211_v54  ;;  %v190_v54 = vld [vmem:[%s1826_s0 + $0x268] sm:$0xff]  ;;  %v188_v45 = vld [vmem:[%s1826_s0 + $0x258] sm:$0xff] }
  0x2b   :  { %624 = vmatprep.mubr.bf16.mxu0 %v219_v1  ;;  %1123 = vmatpush3.bf16.msra.mxu0 %v1254_v2  ;;  %v239_v56 = vpack.c.bf16 %v190_v54, %v183_v53  ;;  %v125_v1 = vld [vmem:[%s1826_s0 + $0x60] sm:$0xff]  ;;  %v246_v2 = vpack.c.bf16 %v197_v63, %v197_v63  ;;  %v194_v53 = vld [vmem:[%s1826_s0 + $0x288] sm:$0xff] }
  0x2c   :  { %705 = vmatmul.mubr.bf16.gmra.mrb[4].mxu1 %v213_v61  ;;  %1124 = vmatprep.subr.bf16.mxu0 %v1255_v10  ;;  %v241_v61 = vpack.c.bf16 %v192_v58, %v185_v57  ;;  %v209_v4 = vpack.c.bf16 %v125_v1, %v118_v0  ;;  %v208_v10 = vpack.c.bf16 %v124_v7, %v117_v6  ;;  %v202_v54 = vld [vmem:[%s1826_s0 + $0x2c8] sm:$0xff]  ;;  %v196_v57 = vld [vmem:[%s1826_s0 + $0x298] sm:$0xff]  ;;  %v1732_v1 = vld [vmem:[%s1827_s2] ss:$0 sm:$0xff] }
  0x2d   :  { %712 = vmatprep.mubr.bf16.mxu1 %v221_v9  ;;  %v139_v9 = vld [vmem:[%s1826_s0 + $0xd0] sm:$0xff]  ;;  %v251_v58 = vpack.c.bf16 %v202_v54, %v202_v54 }
  0x2e   :  { %v216_v13 = vpack.c.bf16 %v139_v9, %v132_v8 }
  0x2f   :  { %1125 = vmatpush3.bf16.msra.mxu0 %v1256_v12  ;;  %v126_v12 = vld [vmem:[%s1826_s0 + $0x68] sm:$0xff] }
  0x30   :  { %1126 = vmatprep.subr.bf16.mxu0 %v1257_v21  ;;  %v140_v21 = vld [vmem:[%s1826_s0 + $0xd8] sm:$0xff] }
  0x32   :  { %625 = vmatmul.mubr.bf16.gmra.mrb[8].mxu0 %v218_v11  ;;  %v119_v11 = vld [vmem:[%s1826_s0 + $0x30] sm:$0xff] }
  0x33   :  { %632 = vmatprep.mubr.bf16.mxu0 %v226_v15  ;;  %1127 = vmatpush3.bf16.msra.mxu0 %v1258_v23  ;;  %v210_v14 = vpack.c.bf16 %v126_v12, %v119_v11  ;;  %v131_v15 = vld [vmem:[%s1826_s0 + $0x90] sm:$0xff] }
  0x34   :  { %713 = vmatmul.mubr.bf16.gmra.mrb[8].mxu1 %v220_v18  ;;  %1128 = vmatprep.subr.bf16.mxu0 %v1259_v32  ;;  %v153_v18 = vld [vmem:[%s1826_s0 + $0x140] sm:$0xff]  ;;  %v215_v19 = vpack.c.bf16 %v138_v16, %v131_v15 }
  0x35   :  { %720 = vmatprep.mubr.bf16.mxu1 %v228_v20  ;;  %v133_v20 = vld [vmem:[%s1826_s0 + $0xa0] sm:$0xff]  ;;  %v223_v22 = vpack.c.bf16 %v153_v18, %v146_v17 }
  0x36   :  { %v217_v23 = vpack.c.bf16 %v140_v21, %v133_v20 }
  0x37   :  { %1129 = vmatpush3.bf16.msra.mxu0 %v1260_v33  ;;  %v159_v33 = vld [vmem:[%s1826_s0 + $0x170] sm:$0xff] }
  0x38   :  { %1130 = vmatprep.subr.bf16.mxu0 %v1261_v40  ;;  %v237_v40 = vpack.c.bf16 %v181_v36, %v174_v35 }
  0x3a   :  { %633 = vmatmul.mubr.bf16.gmra.mrb[12].mxu0 %v225_v29  ;;  %v147_v29 = vld [vmem:[%s1826_s0 + $0x110] sm:$0xff] }
  0x3b   :  { %640 = vmatprep.mubr.bf16.mxu0 %v233_v31  ;;  %1131 = vmatpush3.bf16.msra.mxu0 %v1262_v41  ;;  %v230_v31 = vpack.c.bf16 %v167_v27, %v160_v26  ;;  %v224_v32 = vpack.c.bf16 %v154_v30, %v147_v29  ;;  %v231_v41 = vpack.c.bf16 %v168_v39, %v161_v38 }
  0x3c   :  { %721 = vmatmul.mubr.bf16.gmra.mrb[12].mxu1 %v227_v34  ;;  %1132 = vmatprep.subr.bf16.mxu0 %v1263_v47  ;;  %v166_v34 = vld [vmem:[%s1826_s0 + $0x1a8] sm:$0xff]  ;;  %v236_v47 = vpack.c.bf16 %v180_v44, %v173_v42 }
  0x3d   :  { %728 = vmatprep.mubr.bf16.mxu1 %v235_v37  ;;  %v229_v37 = vpack.c.bf16 %v166_v34, %v159_v33 }
  0x3f   :  { %1133 = vmatpush3.bf16.msra.mxu0 %v1264_v50 }
  0x42   :  { %641 = vmatmul.mubr.bf16.gmra.mrb[16].mxu0 %v232_v46  ;;  %v195_v46 = vld [vmem:[%s1826_s0 + $0x290] sm:$0xff] }
  0x43   :  { %648 = vmatprep.mubr.bf16.mxu0 %v240_v48  ;;  %v175_v48 = vld [vmem:[%s1826_s0 + $0x1f0] sm:$0xff]  ;;  %v244_v50 = vpack.c.bf16 %v195_v46, %v188_v45 }
  0x44   :  { %729 = vmatmul.mubr.bf16.gmra.mrb[16].mxu1 %v234_v51  ;;  %v238_v51 = vpack.c.bf16 %v182_v49, %v175_v48 }
  0x45   :  { %736 = vmatprep.mubr.bf16.mxu1 %v242_v52  ;;  %v187_v52 = vld [vmem:[%s1826_s0 + $0x250] sm:$0xff] }
  0x46   :  { %v243_v55 = vpack.c.bf16 %v194_v53, %v187_v52 }
  0x4a   :  { %649 = vmatmul.mubr.bf16.gmra.mrb[20].mxu0 %v239_v56  ;;  %v189_v56 = vld [vmem:[%s1826_s0 + $0x260] sm:$0xff] }
  0x4b   :  { %656 = vmatprep.mubr.bf16.mxu0 %v247_v59  ;;  %v245_v59 = vpack.c.bf16 %v196_v57, %v189_v56 }
  0x4c   :  { %737 = vmatmul.mubr.bf16.gmra.mrb[20].mxu1 %v241_v61  ;;  %v250_v61 = vpack.c.bf16 %v201_v60, %v201_v60 }
  0x4d   :  { %744 = vmatprep.mubr.bf16.mxu1 %v249_v62  ;;  %v203_v62 = vld [vmem:[%s1826_s0 + $0x2d0] sm:$0xff] }
  0x4e   :  { %v252_v63 = vpack.c.bf16 %v203_v62, %v203_v62 }
  0x52   :  { %657 = vmatmul.mubr.bf16.gmra.mrb[24].mxu0 %v246_v2 }
  0x53   :  { %784 = vmatprep.mubr.bf16.mxu0 %v209_v4 }
  0x54   :  { %745 = vmatmul.mubr.bf16.gmra.mrb[24].mxu1 %v248_v5 }
  0x55   :  { %1186 = vmatprep.mubr.msk.bf16.mxu1 %vm1266_vm0, %v1265_v43 }
  0x5a   :  { %785 = vmatmul.mubr.bf16.vlgmr.msra.gmra.mrb[28].mxu0 %v208_v10 }
  0x5b   :  { %792 = vmatprep.mubr.bf16.mxu0 %v216_v13 }
  0x5c   :  { %1187 = vmatmul.mubr.msk.bf16.vlgmr.msra.gmra.mrb[28].mxu1 %vm554_vm1, %v210_v14 }
  0x5d   :  { %1190 = vmatprep.mubr.msk.bf16.mxu1 %vm1266_vm0, %v1265_v43 }
  0x62   :  { %793 = vmatmul.mubr.bf16.gmra.mrb[32].mxu0 %v215_v19 }
  0x63   :  { %800 = vmatprep.mubr.bf16.mxu0 %v223_v22 }
  0x64   :  { %1191 = vmatmul.mubr.msk.bf16.gmra.mrb[32].mxu1 %vm554_vm1, %v217_v23 }
  0x65   :  { %1194 = vmatprep.mubr.msk.bf16.mxu1 %vm1266_vm0, %v1265_v43 }
  0x6a   :  { %801 = vmatmul.mubr.bf16.gmra.mrb[36].mxu0 %v222_v28 }
  0x6b   :  { %808 = vmatprep.mubr.bf16.mxu0 %v230_v31 }
  0x6c   :  { %1195 = vmatmul.mubr.msk.bf16.gmra.mrb[36].mxu1 %vm554_vm1, %v224_v32 }
  0x6d   :  { %1198 = vmatprep.mubr.msk.bf16.mxu1 %vm1266_vm0, %v1265_v43 }
  0x72   :  { %809 = vmatmul.mubr.bf16.gmra.mrb[40].mxu0 %v229_v37 }
  0x73   :  { %816 = vmatprep.mubr.bf16.mxu0 %v237_v40 }
  0x74   :  { %1199 = vmatmul.mubr.msk.bf16.gmra.mrb[40].mxu1 %vm554_vm1, %v231_v41 }
  0x75   :  { %1202 = vmatprep.mubr.msk.bf16.mxu1 %vm1266_vm0, %v1265_v43 }
  0x7a   :  { %817 = vmatmul.mubr.bf16.gmra.mrb[44].mxu0 %v236_v47 }
  0x7b   :  { %824 = vmatprep.mubr.bf16.mxu0 %v244_v50 }
  0x7c   :  { %1203 = vmatmul.mubr.msk.bf16.gmra.mrb[44].mxu1 %vm554_vm1, %v238_v51 }
  0x7d   :  { %1206 = vmatprep.mubr.msk.bf16.mxu1 %vm1266_vm0, %v1265_v43 }
  0x82   :  { %825 = vmatmul.mubr.bf16.gmra.mrb[48].mxu0 %v243_v55 }
  0x83   :  { %832 = vmatprep.mubr.bf16.mxu0 %v251_v58 }
  0x84   :  { %1207 = vmatmul.mubr.msk.bf16.gmra.mrb[48].mxu1 %vm554_vm1, %v245_v59 }
  0x85   :  { %1210 = vmatprep.mubr.msk.bf16.mxu1 %vm1266_vm0, %v1265_v43 }
  0x8a   :  { %833 = vmatmul.mubr.bf16.gmra.mrb[52].mxu0 %v250_v61 }
  0x8c   :  { %1211 = vmatmul.mubr.msk.bf16.gmra.mrb[52].mxu1 %vm554_vm1, %v252_v63 }
  0xf5   :  { %v1018_v0 = vpop.f32.mrb[0].mxu0 }
  0xf6   :  { %v1019_v2 = vpop.f32.mrb[1].mxu0 }
  0xf7   :  { %v1020_v3 = vadd.f32 %v1019_v2, %v1018_v0  ;;  %v1021_v4 = vpop.f32.mrb[2].mxu0  ;;  %v1076_v5 = vpop.f32.mrb[0].mxu1 }
  0xf8   :  { %v1022_v6 = vpop.f32.mrb[3].mxu0  ;;  %v1077_v8 = vpop.f32.mrb[1].mxu1 }
  0xf9   :  { %v611_v43 = vadd.f32 %v1020_v3, %v1732_v1  ;;  %v1023_v7 = vadd.f32 %v1022_v6, %v1021_v4  ;;  %v1078_v9 = vadd.f32 %v1077_v8, %v1076_v5  ;;  %v1079_v10 = vpop.f32.mrb[2].mxu1 }
  0xfa   :  { %v1080_v12 = vpop.f32.mrb[3].mxu1 }
  0xfb   :  { %v614_v11 = vadd.f32 %v1023_v7, %v1732_v1  ;;  %v1736_v13 = vadd.f32 %v1078_v9, %v611_v43  ;;  %v1081_v14 = vadd.f32 %v1080_v12, %v1079_v10 }
  0xfd   :  { %v1024_v15 = vpop.f32.mrb[4].mxu0  ;;  %v1738_v16 = vadd.f32 %v1081_v14, %v614_v11 }
  0xfe   :  { %v1025_v17 = vpop.f32.mrb[5].mxu0 }
  0xff   :  { %v1026_v18 = vadd.f32 %v1025_v17, %v1024_v15  ;;  %v1027_v19 = vpop.f32.mrb[6].mxu0  ;;  %v1082_v20 = vpop.f32.mrb[4].mxu1 }
 0x100   :  { %v1028_v21 = vpop.f32.mrb[7].mxu0  ;;  %v1083_v24 = vpop.f32.mrb[5].mxu1 }
 0x101   :  { %v619_v22 = vadd.f32 %v1026_v18, %v1732_v1  ;;  %v1029_v23 = vadd.f32 %v1028_v21, %v1027_v19  ;;  %v1084_v25 = vadd.f32 %v1083_v24, %v1082_v20  ;;  %v1085_v26 = vpop.f32.mrb[6].mxu1 }
 0x102   :  { %v1086_v28 = vpop.f32.mrb[7].mxu1 }
 0x103   :  { %v622_v27 = vadd.f32 %v1029_v23, %v1732_v1  ;;  %v1742_v29 = vadd.f32 %v1084_v25, %v619_v22  ;;  %v1087_v30 = vadd.f32 %v1086_v28, %v1085_v26 }
 0x105   :  { %v1030_v31 = vpop.f32.mrb[8].mxu0  ;;  %v1744_v32 = vadd.f32 %v1087_v30, %v622_v27 }
 0x106   :  { %v1031_v33 = vpop.f32.mrb[9].mxu0 }
 0x107   :  { %v1032_v34 = vadd.f32 %v1031_v33, %v1030_v31  ;;  %v1033_v35 = vpop.f32.mrb[10].mxu0  ;;  %v1088_v36 = vpop.f32.mrb[8].mxu1 }
 0x108   :  { %v1034_v37 = vpop.f32.mrb[11].mxu0  ;;  %v1089_v40 = vpop.f32.mrb[9].mxu1 }
 0x109   :  { %v627_v38 = vadd.f32 %v1032_v34, %v1732_v1  ;;  %v1035_v39 = vadd.f32 %v1034_v37, %v1033_v35  ;;  %v1090_v41 = vadd.f32 %v1089_v40, %v1088_v36  ;;  %v1091_v42 = vpop.f32.mrb[10].mxu1 }
 0x10a   :  { %v1092_v45 = vpop.f32.mrb[11].mxu1 }
 0x10b   :  { %v630_v44 = vadd.f32 %v1035_v39, %v1732_v1  ;;  %v1748_v46 = vadd.f32 %v1090_v41, %v627_v38  ;;  %v1093_v47 = vadd.f32 %v1092_v45, %v1091_v42 }
 0x10d   :  { %v1036_v48 = vpop.f32.mrb[12].mxu0  ;;  %v1750_v49 = vadd.f32 %v1093_v47, %v630_v44 }
 0x10e   :  { %v1037_v50 = vpop.f32.mrb[13].mxu0 }
 0x10f   :  { %v1038_v51 = vadd.f32 %v1037_v50, %v1036_v48  ;;  %v1039_v52 = vpop.f32.mrb[14].mxu0  ;;  %v1094_v53 = vpop.f32.mrb[12].mxu1 }
 0x110   :  { %v1040_v54 = vpop.f32.mrb[15].mxu0  ;;  %v1095_v57 = vpop.f32.mrb[13].mxu1 }
 0x111   :  { %v635_v55 = vadd.f32 %v1038_v51, %v1732_v1  ;;  %v1041_v56 = vadd.f32 %v1040_v54, %v1039_v52  ;;  %v1096_v58 = vadd.f32 %v1095_v57, %v1094_v53  ;;  %v1097_v59 = vpop.f32.mrb[14].mxu1 }
 0x112   :  { %v1098_v61 = vpop.f32.mrb[15].mxu1 }
 0x113   :  { %v638_v60 = vadd.f32 %v1041_v56, %v1732_v1  ;;  %v1754_v62 = vadd.f32 %v1096_v58, %v635_v55  ;;  %v1099_v63 = vadd.f32 %v1098_v61, %v1097_v59 }
 0x115   :  { %v1042_v0 = vpop.f32.mrb[16].mxu0  ;;  %v1756_v2 = vadd.f32 %v1099_v63, %v638_v60 }
 0x116   :  { %v1043_v3 = vpop.f32.mrb[17].mxu0 }
 0x117   :  { %v1044_v4 = vadd.f32 %v1043_v3, %v1042_v0  ;;  %v1045_v5 = vpop.f32.mrb[18].mxu0  ;;  %v1100_v6 = vpop.f32.mrb[16].mxu1 }
 0x118   :  { %v1046_v43 = vpop.f32.mrb[19].mxu0  ;;  %v1101_v9 = vpop.f32.mrb[17].mxu1 }
 0x119   :  { %v643_v7 = vadd.f32 %v1044_v4, %v1732_v1  ;;  %v1047_v8 = vadd.f32 %v1046_v43, %v1045_v5  ;;  %v1102_v10 = vadd.f32 %v1101_v9, %v1100_v6  ;;  %v1103_v11 = vpop.f32.mrb[18].mxu1 }
 0x11a   :  { %v1104_v14 = vpop.f32.mrb[19].mxu1 }
 0x11b   :  { %v646_v12 = vadd.f32 %v1047_v8, %v1732_v1  ;;  %v1760_v15 = vadd.f32 %v1102_v10, %v643_v7  ;;  %v1105_v17 = vadd.f32 %v1104_v14, %v1103_v11 }
 0x11d   :  { %v1048_v18 = vpop.f32.mrb[20].mxu0  ;;  %v1762_v19 = vadd.f32 %v1105_v17, %v646_v12 }
 0x11e   :  { %v1049_v20 = vpop.f32.mrb[21].mxu0 }
 0x11f   :  { %v1050_v21 = vadd.f32 %v1049_v20, %v1048_v18  ;;  %v1051_v22 = vpop.f32.mrb[22].mxu0  ;;  %v1106_v23 = vpop.f32.mrb[20].mxu1 }
 0x120   :  { %v1052_v24 = vpop.f32.mrb[23].mxu0  ;;  %v1107_v27 = vpop.f32.mrb[21].mxu1 }
 0x121   :  { %v651_v25 = vadd.f32 %v1050_v21, %v1732_v1  ;;  %v1053_v26 = vadd.f32 %v1052_v24, %v1051_v22  ;;  %v1108_v28 = vadd.f32 %v1107_v27, %v1106_v23  ;;  %v1109_v30 = vpop.f32.mrb[22].mxu1 }
 0x122   :  { %v1110_v33 = vpop.f32.mrb[23].mxu1 }
 0x123   :  { %v654_v31 = vadd.f32 %v1053_v26, %v1732_v1  ;;  %v1766_v34 = vadd.f32 %v1108_v28, %v651_v25  ;;  %v1111_v35 = vadd.f32 %v1110_v33, %v1109_v30 }
 0x125   :  { %v1054_v36 = vpop.f32.mrb[24].mxu0  ;;  %v1768_v37 = vadd.f32 %v1111_v35, %v654_v31 }
 0x126   :  { %v1055_v38 = vpop.f32.mrb[25].mxu0 }
 0x127   :  { %v1056_v39 = vadd.f32 %v1055_v38, %v1054_v36  ;;  %v1057_v40 = vpop.f32.mrb[26].mxu0  ;;  %v1112_v41 = vpop.f32.mrb[24].mxu1 }
 0x128   :  { %v1058_v42 = vpop.f32.mrb[27].mxu0  ;;  %v1113_v45 = vpop.f32.mrb[25].mxu1 }
 0x129   :  { %v659_v44 = vadd.f32 %v1056_v39, %v1732_v1  ;;  %v1114_v47 = vadd.f32 %v1113_v45, %v1112_v41  ;;  %v1115_v48 = vpop.f32.mrb[26].mxu1 }
 0x12a   :  { %v1116_v50 = vpop.f32.mrb[27].mxu1 }
 0x12b   :  { %v1771_v51 = vadd.f32 %v1114_v47, %v659_v44 }
 0x12d   :  { %v1134_v52 = vpop.f32.mrb[28].mxu0 }
 0x12e   :  { %v1135_v53 = vpop.f32.mrb[29].mxu0 }
 0x12f   :  { %v1136_v54 = vadd.f32 %v1135_v53, %v1134_v52  ;;  %v1137_v55 = vpop.f32.mrb[30].mxu0  ;;  %v874_v57 = vpop.f32.mrb[28].mxu1 }
 0x130   :  { %v1138_v56 = vpop.f32.mrb[31].mxu0  ;;  %v1188_v60 = vpop.f32.mrb[29].mxu1 }
 0x131   :  { %v1139_v58 = vadd.f32 %v1138_v56, %v1137_v55  ;;  %v787_v59 = vadd.f32 %v1136_v54, %v1736_v13  ;;  %v877_v61 = vpop.f32.mrb[30].mxu1 }
 0x132   :  { %v1189_v0 = vpop.f32.mrb[31].mxu1 }
 0x133   :  { %v875_v63 = vadd.f32 %v874_v57, %v787_v59  ;;  %v790_v1 = vadd.f32 %v1139_v58, %v1738_v16 }
 0x135   :  { %928 = vst [vmem:[%s1828_s3] sm:$0xff] %v875_v63  ;;  %v878_v3 = vadd.f32 %v877_v61, %v790_v1  ;;  %v1140_v4 = vpop.f32.mrb[32].mxu0 }
 0x136   :  { %v1141_v5 = vpop.f32.mrb[33].mxu0 }
 0x137   :  { %929 = vst [vmem:[%s1828_s3 + $0x8] sm:$0xff] %v878_v3  ;;  %v1142_v6 = vadd.f32 %v1141_v5, %v1140_v4  ;;  %v1143_v43 = vpop.f32.mrb[34].mxu0  ;;  %v882_v7 = vpop.f32.mrb[32].mxu1 }
 0x138   :  { %v1144_v13 = vpop.f32.mrb[35].mxu0  ;;  %v1192_v16 = vpop.f32.mrb[33].mxu1 }
 0x139   :  { %v1145_v8 = vadd.f32 %v1144_v13, %v1143_v43  ;;  %v795_v9 = vadd.f32 %v1142_v6, %v1742_v29  ;;  %v885_v10 = vpop.f32.mrb[34].mxu1 }
 0x13a   :  { %v1193_v14 = vpop.f32.mrb[35].mxu1 }
 0x13b   :  { %v883_v11 = vadd.f32 %v882_v7, %v795_v9  ;;  %v798_v12 = vadd.f32 %v1145_v8, %v1744_v32 }
 0x13d   :  { %930 = vst [vmem:[%s1828_s3 + $0x10] sm:$0xff] %v883_v11  ;;  %v886_v17 = vadd.f32 %v885_v10, %v798_v12  ;;  %v1146_v18 = vpop.f32.mrb[36].mxu0 }
 0x13e   :  { %v1147_v20 = vpop.f32.mrb[37].mxu0 }
 0x13f   :  { %931 = vst [vmem:[%s1828_s3 + $0x18] sm:$0xff] %v886_v17  ;;  %v1148_v21 = vadd.f32 %v1147_v20, %v1146_v18  ;;  %v1149_v22 = vpop.f32.mrb[38].mxu0  ;;  %v890_v23 = vpop.f32.mrb[36].mxu1 }
 0x140   :  { %v1150_v29 = vpop.f32.mrb[39].mxu0  ;;  %v1196_v32 = vpop.f32.mrb[37].mxu1 }
 0x141   :  { %v1151_v24 = vadd.f32 %v1150_v29, %v1149_v22  ;;  %v803_v25 = vadd.f32 %v1148_v21, %v1748_v46  ;;  %v893_v26 = vpop.f32.mrb[38].mxu1 }
 0x142   :  { %v1197_v30 = vpop.f32.mrb[39].mxu1 }
 0x143   :  { %v891_v27 = vadd.f32 %v890_v23, %v803_v25  ;;  %v806_v28 = vadd.f32 %v1151_v24, %v1750_v49 }
 0x145   :  { %932 = vst [vmem:[%s1828_s3 + $0x20] sm:$0xff] %v891_v27  ;;  %v894_v31 = vadd.f32 %v893_v26, %v806_v28  ;;  %v1152_v33 = vpop.f32.mrb[40].mxu0 }
 0x146   :  { %v1153_v35 = vpop.f32.mrb[41].mxu0 }
 0x147   :  { %933 = vst [vmem:[%s1828_s3 + $0x28] sm:$0xff] %v894_v31  ;;  %v1154_v36 = vadd.f32 %v1153_v35, %v1152_v33  ;;  %v1155_v38 = vpop.f32.mrb[42].mxu0  ;;  %v898_v39 = vpop.f32.mrb[40].mxu1 }
 0x148   :  { %v1156_v46 = vpop.f32.mrb[43].mxu0  ;;  %v1200_v49 = vpop.f32.mrb[41].mxu1 }
 0x149   :  { %v1157_v40 = vadd.f32 %v1156_v46, %v1155_v38  ;;  %v811_v41 = vadd.f32 %v1154_v36, %v1754_v62  ;;  %v901_v42 = vpop.f32.mrb[42].mxu1 }
 0x14a   :  { %v1201_v47 = vpop.f32.mrb[43].mxu1 }
 0x14b   :  { %v899_v44 = vadd.f32 %v898_v39, %v811_v41  ;;  %v814_v45 = vadd.f32 %v1157_v40, %v1756_v2 }
 0x14d   :  { %934 = vst [vmem:[%s1828_s3 + $0x30] sm:$0xff] %v899_v44  ;;  %v902_v48 = vadd.f32 %v901_v42, %v814_v45  ;;  %v1158_v50 = vpop.f32.mrb[44].mxu0 }
 0x14e   :  { %v1159_v52 = vpop.f32.mrb[45].mxu0 }
 0x14f   :  { %935 = vst [vmem:[%s1828_s3 + $0x38] sm:$0xff] %v902_v48  ;;  %v1160_v53 = vadd.f32 %v1159_v52, %v1158_v50  ;;  %v1161_v54 = vpop.f32.mrb[46].mxu0  ;;  %v906_v55 = vpop.f32.mrb[44].mxu1 }
 0x150   :  { %v1162_v62 = vpop.f32.mrb[47].mxu0  ;;  %v1204_v2 = vpop.f32.mrb[45].mxu1 }
 0x151   :  { %v1163_v56 = vadd.f32 %v1162_v62, %v1161_v54  ;;  %v819_v57 = vadd.f32 %v1160_v53, %v1760_v15  ;;  %v909_v58 = vpop.f32.mrb[46].mxu1 }
 0x152   :  { %v1205_v61 = vpop.f32.mrb[47].mxu1 }
 0x153   :  { %v907_v59 = vadd.f32 %v906_v55, %v819_v57  ;;  %v822_v60 = vadd.f32 %v1163_v56, %v1762_v19 }
 0x155   :  { %936 = vst [vmem:[%s1828_s3 + $0x40] sm:$0xff] %v907_v59  ;;  %v910_v63 = vadd.f32 %v909_v58, %v822_v60  ;;  %v1164_v1 = vpop.f32.mrb[48].mxu0 }
 0x156   :  { %v1165_v0 = vpop.f32.mrb[49].mxu0 }
 0x157   :  { %937 = vst [vmem:[%s1828_s3 + $0x48] sm:$0xff] %v910_v63  ;;  %v1166_v3 = vadd.f32 %v1165_v0, %v1164_v1  ;;  %v1167_v4 = vpop.f32.mrb[50].mxu0  ;;  %v914_v5 = vpop.f32.mrb[48].mxu1 }
 0x158   :  { %v1168_v15 = vpop.f32.mrb[51].mxu0  ;;  %v1208_v19 = vpop.f32.mrb[49].mxu1 }
 0x159   :  { %v1169_v6 = vadd.f32 %v1168_v15, %v1167_v4  ;;  %v827_v43 = vadd.f32 %v1166_v3, %v1766_v34  ;;  %v917_v13 = vpop.f32.mrb[50].mxu1 }
 0x15a   :  { %v1209_v9 = vpop.f32.mrb[51].mxu1 }
 0x15b   :  { %v915_v7 = vadd.f32 %v914_v5, %v827_v43  ;;  %v830_v8 = vadd.f32 %v1169_v6, %v1768_v37 }
 0x15d   :  { %938 = vst [vmem:[%s1828_s3 + $0x50] sm:$0xff] %v915_v7  ;;  %v918_v16 = vadd.f32 %v917_v13, %v830_v8  ;;  %v1170_v10 = vpop.f32.mrb[52].mxu0 }
 0x15e   :  { %v1171_v11 = vpop.f32.mrb[53].mxu0 }
 0x15f   :  { %939 = vst [vmem:[%s1828_s3 + $0x58] sm:$0xff] %v918_v16  ;;  %v1172_v12 = vadd.f32 %v1171_v11, %v1170_v10  ;;  %v1173_v14 = vpop.f32.mrb[54].mxu0  ;;  %v922_v17 = vpop.f32.mrb[52].mxu1 }
 0x160   :  { %v1174_v34 = vpop.f32.mrb[55].mxu0  ;;  %v1212_v20 = vpop.f32.mrb[53].mxu1 }
 0x161   :  { %v835_v18 = vadd.f32 %v1172_v12, %v1771_v51  ;;  %v925_v37 = vpop.f32.mrb[54].mxu1 }
 0x162   :  { %v1213_v22 = vpop.f32.mrb[55].mxu1 }
 0x163   :  { %v923_v21 = vadd.f32 %v922_v17, %v835_v18 }
 0x165   :  { %940 = vst [vmem:[%s1828_s3 + $0x60] sm:$0xff] %v923_v21 }

</bundles_post_ra>
